<compile_context>
chip_gen: v5e
topology: v5e:2x2
jax: 0.10.0
libtpu: 0.0.40
codegen_flags: <defaults>
</compile_context>

<pallas_src>
import jax
import jax.numpy as jnp
from jax import lax
from jax.experimental import pallas as pl
from jax.experimental.pallas import tpu as pltpu


def _round_up(x, m):
    return ((x + m - 1) // m) * m


def _mha_linear_kernel_single_k(x_ref, w_ref, b_ref, o_ref):
    # Single reduction step: no scratch accumulator needed.
    # x_ref: [tm, K]   w_ref: [tn, K]   b_ref: [1, tn]   o_ref: [tm, tn]
    acc = lax.dot_general(
        x_ref[...], w_ref[...],
        dimension_numbers=(((1,), (1,)), ((), ())),
        preferred_element_type=jnp.float32,
    )
    o_ref[...] = (acc + b_ref[...]).astype(o_ref.dtype)


def _mha_linear_kernel_multi_k(x_ref, w_ref, b_ref, o_ref, acc_ref):
    # x_ref  : [tm, tk]  input tile                        (VMEM)
    # w_ref  : [tn, tk]  weight tile, nn.Linear layout [N, K] (no transpose)
    # b_ref  : [1,  tn]  bias tile (f32)
    # o_ref  : [tm, tn]  output tile
    # acc_ref: [tm, tn]  f32 accumulator scratch, persists across K steps
    k = pl.program_id(2)

    @pl.when(k == 0)
    def _():
        acc_ref[...] = jnp.zeros_like(acc_ref)

    acc_ref[...] += lax.dot_general(
        x_ref[...], w_ref[...],
        dimension_numbers=(((1,), (1,)), ((), ())),
        preferred_element_type=jnp.float32,
    )

    @pl.when(k == pl.num_programs(2) - 1)
    def _():
        o_ref[...] = (acc_ref[...] + b_ref[...]).astype(o_ref.dtype)


def prepare_for_multi_head_attention(x, weight, bias, heads, d_k,
                                     *, tm=512, tn=512, tk=512):
    """Equivalent of the PyTorch module's forward.

    Args:
      x:      [..., d_model]
      weight: [heads*d_k, d_model]  (nn.Linear convention, NOT transposed)
      bias:   [heads*d_k] or None
      heads, d_k: ints

    Returns:
      [..., heads, d_k]
    """
    head_shape = x.shape[:-1]
    d_model = x.shape[-1]
    n_out = heads * d_k
    assert weight.shape == (n_out, d_model)

    m = 1
    for s in head_shape:
        m *= s
    x2d = x.reshape(m, d_model)

    if bias is None:
        b2d = jnp.zeros((1, n_out), dtype=jnp.float32)
    else:
        b2d = bias.reshape(1, n_out).astype(jnp.float32)

    itemsize = jnp.dtype(x.dtype).itemsize

    # ---- tile sizing (MXU / lane aligned, clamped to padded problem) ----
    tm = min(tm, _round_up(m, 8))              # sublane-aligned M tile
    tn = min(tn, _round_up(n_out, 128))        # lane-dense N tile (mult of 128)

    if d_model <= tk:
        # Whole reduction in one tile: block == full array dim (legal even if
        # not a multiple of 128), so no K zero-padding at all.
        tk = kp = d_model
    else:
        tk = _round_up(tk, 128)
        kp = _round_up(d_model, tk)

    mp = _round_up(m, tm)
    np_ = _round_up(n_out, tn)

    # ---- zero-pad to tile multiples (zeros are matmul-neutral) ----
    if (mp, kp) != (m, d_model):
        x2d = jnp.pad(x2d, ((0, mp - m), (0, kp - d_model)))
    w2d = weight
    if (np_, kp) != (n_out, d_model):
        w2d = jnp.pad(w2d, ((0, np_ - n_out), (0, kp - d_model)))
    if np_ != n_out:
        b2d = jnp.pad(b2d, ((0, 0), (0, np_ - n_out)))

    nk = kp // tk
    single_k = (nk == 1)

    cost = pl.CostEstimate(
        flops=2 * mp * np_ * kp,
        bytes_accessed=itemsize * (mp * kp + np_ * kp + mp * np_) + 4 * np_,
        transcendentals=0,
    )

    # VMEM budget: double-buffered x/w/bias tiles + output tile (+ f32 acc).
    vmem_needed = (2 * (tm * tk + tn * tk) * itemsize
                   + 2 * tn * 4
                   + 2 * tm * tn * itemsize
                   + (0 if single_k else tm * tn * 4))
    vmem_limit = int(min(64 * 1024 * 1024,
                         max(32 * 1024 * 1024, vmem_needed * 2)))

    if single_k:
        grid = (mp // tm, np_ // tn)
        grid_spec = pltpu.PrefetchScalarGridSpec(
            num_scalar_prefetch=0,
            grid=grid,
            in_specs=[
                pl.BlockSpec((tm, tk), lambda i, j: (i, 0)),   # x
                pl.BlockSpec((tn, tk), lambda i, j: (j, 0)),   # W (nn.Linear layout)
                pl.BlockSpec((1, tn), lambda i, j: (0, j)),    # bias
            ],
            out_specs=pl.BlockSpec((tm, tn), lambda i, j: (i, j)),
            scratch_shapes=[],
        )
        kernel = _mha_linear_kernel_single_k
        dim_sem = ("parallel", "parallel")
    else:
        grid = (mp // tm, np_ // tn, nk)   # reduction (K) axis last / innermost
        grid_spec = pltpu.PrefetchScalarGridSpec(
            num_scalar_prefetch=0,
            grid=grid,
            in_specs=[
                pl.BlockSpec((tm, tk), lambda i, j, k: (i, k)),   # x
                pl.BlockSpec((tn, tk), lambda i, j, k: (j, k)),   # W
                pl.BlockSpec((1, tn), lambda i, j, k: (0, j)),    # bias
            ],
            out_specs=pl.BlockSpec((tm, tn), lambda i, j, k: (i, j)),
            scratch_shapes=[pltpu.VMEM((tm, tn), jnp.float32)],
        )
        kernel = _mha_linear_kernel_multi_k
        dim_sem = ("parallel", "parallel", "arbitrary")

    out2d = pl.pallas_call(
        kernel,
        out_shape=jax.ShapeDtypeStruct((mp, np_), x.dtype),
        grid_spec=grid_spec,
        compiler_params=pltpu.CompilerParams(
            dimension_semantics=dim_sem,
            vmem_limit_bytes=vmem_limit,
        ),
        cost_estimate=cost,
    )(x2d, w2d, b2d)

    out2d = out2d[:m, :n_out]
    # Free metadata reshape: keep the lane-dense slab inside the kernel, split
    # (heads, d_k) only here.
    return out2d.reshape(*head_shape, heads, d_k)


if __name__ == "__main__":
    # Small shapes consistent with the module: d_model=32, heads=4, d_k=8, bias=True
    seq, batch, d_model = 8, 2, 32
    heads, d_k = 4, 8
    n_out = heads * d_k

    key = jax.random.PRNGKey(0)
    kx, kw, kb = jax.random.split(key, 3)

    x = jax.random.normal(kx, (seq, batch, d_model), dtype=jnp.float32)
    # Deterministic parameter init (nn.Linear-like uniform bound 1/sqrt(d_model))
    bound = 1.0 / (d_model ** 0.5)
    weight = jax.random.uniform(kw, (n_out, d_model), dtype=jnp.float32,
                                minval=-bound, maxval=bound)
    bias = jax.random.uniform(kb, (n_out,), dtype=jnp.float32,
                              minval=-bound, maxval=bound)

    out = prepare_for_multi_head_attention(x, weight, bias, heads, d_k)
    out = jax.block_until_ready(out)

    # Reference check against plain JAX
    ref = (x.reshape(-1, d_model) @ weight.T + bias).reshape(seq, batch, heads, d_k)
    assert out.shape == (seq, batch, heads, d_k)
    assert jnp.allclose(out, ref, atol=1e-5, rtol=1e-5)

    # Also exercise a larger, multi-tile / multi-K config once for coverage.
    d_model2, heads2, d_k2 = 1024, 8, 64
    n_out2 = heads2 * d_k2
    kx2, kw2, kb2 = jax.random.split(jax.random.PRNGKey(1), 3)
    x2 = jax.random.normal(kx2, (4, 130, d_model2), dtype=jnp.float32)
    w2 = jax.random.normal(kw2, (n_out2, d_model2), dtype=jnp.float32) * 0.02
    b2 = jax.random.normal(kb2, (n_out2,), dtype=jnp.float32) * 0.02
    out2 = prepare_for_multi_head_attention(x2, w2, b2, heads2, d_k2)
    out2 = jax.block_until_ready(out2)
    ref2 = (x2.reshape(-1, d_model2) @ w2.T + b2).reshape(4, 130, heads2, d_k2)
    assert jnp.allclose(out2, ref2, atol=2e-2, rtol=2e-3)

    print("KERNEL_OK")
</pallas_src>

<mosaic_0001>
module attributes {stable_mosaic.version = 11 : i64} {
  func.func @_mha_linear_kernel_single_k(%arg0: i32, %arg1: i32, %arg2: memref<16x32xf32, #tpu.memory_space<vmem>>, %arg3: memref<128x32xf32, #tpu.memory_space<vmem>>, %arg4: memref<1x128xf32, #tpu.memory_space<vmem>>, %arg5: memref<16x128xf32, #tpu.memory_space<vmem>>) attributes {dimension_semantics = [#tpu.dimension_semantics<parallel>, #tpu.dimension_semantics<parallel>], iteration_bounds = array<i64: 1, 1>, scalar_prefetch = 0 : i64, scratch_operands = 0 : i64, tpu.core_type = #tpu.core_type<tc>, window_params = [{transform_indices = @transform_0, window_bounds = array<i64: 16, 32>}, {transform_indices = @transform_1, window_bounds = array<i64: 128, 32>}, {transform_indices = @transform_2, window_bounds = array<i64: 1, 128>}, {transform_indices = @transform_3, window_bounds = array<i64: 16, 128>}]} {
    %c0 = arith.constant 0 : index
    %c0_0 = arith.constant 0 : index
    %0 = vector.load %arg2[%c0, %c0_0] : memref<16x32xf32, #tpu.memory_space<vmem>>, vector<16x32xf32>
    %c0_1 = arith.constant 0 : index
    %c0_2 = arith.constant 0 : index
    %1 = vector.load %arg3[%c0_1, %c0_2] : memref<128x32xf32, #tpu.memory_space<vmem>>, vector<128x32xf32>
    %cst = arith.constant dense<0.000000e+00> : vector<16x128xf32>
    %2 = tpu.matmul %0, %1, %cst {dimension_numbers = #tpu.dot_dimension_numbers<[1], [1], [0], [0], [0, 0, 1, 0], [], []>} : vector<16x32xf32>, vector<128x32xf32>, vector<16x128xf32> -> vector<16x128xf32>
    %c0_3 = arith.constant 0 : index
    %c0_4 = arith.constant 0 : index
    %3 = vector.load %arg4[%c0_3, %c0_4] : memref<1x128xf32, #tpu.memory_space<vmem>>, vector<1x128xf32>
    %4 = vector.broadcast %3 : vector<1x128xf32> to vector<16x128xf32>
    %5 = arith.addf %2, %4 : vector<16x128xf32>
    %c0_5 = arith.constant 0 : index
    %c0_6 = arith.constant 0 : index
    %6 = vector.load %arg5[%c0_5, %c0_6] : memref<16x128xf32, #tpu.memory_space<vmem>>, vector<16x128xf32>
    tpu.vector_store %arg5[%c0_5, %c0_6], %5 {strides = array<i32>} : memref<16x128xf32, #tpu.memory_space<vmem>>, vector<16x128xf32>,
    return
  }
  func.func @transform_0(%arg0: i32, %arg1: i32) -> (i32, i32) {
    %c0_i32 = arith.constant 0 : i32
    %c0_i32_0 = arith.constant 0 : i32
    return %arg0, %c0_i32 : i32, i32
  }
  func.func @transform_1(%arg0: i32, %arg1: i32) -> (i32, i32) {
    %c0_i32 = arith.constant 0 : i32
    %c0_i32_0 = arith.constant 0 : i32
    return %arg1, %c0_i32 : i32, i32
  }
  func.func @transform_2(%arg0: i32, %arg1: i32) -> (i32, i32) {
    %c0_i32 = arith.constant 0 : i32
    %c0_i32_0 = arith.constant 0 : i32
    return %c0_i32, %arg1 : i32, i32
  }
  func.func @transform_3(%arg0: i32, %arg1: i32) -> (i32, i32) {
    %c0_i32 = arith.constant 0 : i32
    return %arg0, %arg1 : i32, i32
  }
}

</mosaic_0001>

<bundles_post_ra>
// kernel: tpu_custom_call.1
= control target key start
LH: loop header
LB: loop body
LE: loop exit
PB: predicated region body
PF: predicated region fallthrough
CT: control target
= control target key end

     0   :  { %vm37_vm0 = vcmask 261120   ;;  %s316_s0 = inlined_call_operand.vmem [shape: f32[16,32], index: 0, kind: input, shape index: {}]   ;;  %s317_s1 = inlined_call_operand.vmem [shape: f32[128,32], index: 1, kind: input, shape index: {}]   ;;  %s318_s2 = inlined_call_operand.vmem [shape: f32[1,128], index: 2, kind: input, shape index: {}]   ;;  %s319_s3 = inlined_call_operand.hbm [shape: f32[16,128], index: 3, kind: output, shape index: {}]  }
   0x1   :  { %v32_v0 = vld [vmem:[%s317_s1 + $0x78] sm:$0xff]  ;;  %v31_v1 = vld [vmem:[%s317_s1 + $0x70] sm:$0xff] }
   0x2   :  { %135 = vmatpush.xpose.msk.msra.mxu0 %vm37_vm0, %v32_v0  ;;  %153 = vmatpush.xpose.msk.msra.mxu1 %vm37_vm0, %v32_v0 }
   0x3   :  { %8 = vsyncpa [#allocation3], 0  ;;  %v30_v2 = vld [vmem:[%s317_s1 + $0x68] sm:$0xff]  ;;  %v29_v3 = vld [vmem:[%s317_s1 + $0x60] sm:$0xff]  ;;  %s123_s26 = sshll.u32 %s319_s3, 4  ;;  %s201_s27 = smov 8   ;;  %s124_s26 = int_to_ptr.hbm [resolvable:$true] %s123_s26 }
   0x4   :  { %v28_v4 = vld [vmem:[%s317_s1 + $0x58] sm:$0xff]  ;;  %v27_v5 = vld [vmem:[%s317_s1 + $0x50] sm:$0xff]  ;;  %v26_v6 = vld [vmem:[%s317_s1 + $0x48] sm:$0xff] }
   0x5   :  { %v25_v7 = vld [vmem:[%s317_s1 + $0x40] sm:$0xff]  ;;  %v24_v8 = vld [vmem:[%s317_s1 + $0x38] sm:$0xff]  ;;  %v23_v9 = vld [vmem:[%s317_s1 + $0x30] sm:$0xff] }
   0x6   :  { %136 = vmatpush.xpose.msk.msra.mxu0 %vm37_vm0, %v31_v1  ;;  %154 = vmatpush.xpose.msk.msra.mxu1 %vm37_vm0, %v31_v1  ;;  %v22_v10 = vld [vmem:[%s317_s1 + $0x28] sm:$0xff]  ;;  %v21_v11 = vld [vmem:[%s317_s1 + $0x20] sm:$0xff]  ;;  %v20_v12 = vld [vmem:[%s317_s1 + $0x18] sm:$0xff] }
   0x7   :  { %v19_v13 = vld [vmem:[%s317_s1 + $0x10] sm:$0xff]  ;;  %v18_v14 = vld [vmem:[%s317_s1 + $0x8] sm:$0xff]  ;;  %v17_v15 = vld [vmem:[%s317_s1] sm:$0xff]  ;;  %s199_s1 = smov [#allocation2]  }
   0x8   :  { %v15_v16 = vld [vmem:[%s316_s0] sm:$0xff]  ;;  %v16_v17 = vld [vmem:[%s316_s0 + $0x8] sm:$0xff]  ;;  %s121_s23 = sshll.u32 %s199_s1, 4  ;;  %s200_s0 = smov 128   ;;  %s122_s23 = int_to_ptr.vmem [resolvable:$true] %s121_s23 }
   0x9   :  { %v172_v18 = vld [vmem:[%s318_s2] ss:$0 sm:$0xff] }
   0xa   :  { %137 = vmatpush.xpose.msk.msra.mxu0 %vm37_vm0, %v30_v2  ;;  %155 = vmatpush.xpose.msk.msra.mxu1 %vm37_vm0, %v30_v2 }
   0xe   :  { %138 = vmatpush.xpose.msk.msra.mxu0 %vm37_vm0, %v29_v3  ;;  %156 = vmatpush.xpose.msk.msra.mxu1 %vm37_vm0, %v29_v3 }
  0x12   :  { %139 = vmatpush.xpose.msk.msra.mxu0 %vm37_vm0, %v28_v4  ;;  %157 = vmatpush.xpose.msk.msra.mxu1 %vm37_vm0, %v28_v4 }
  0x16   :  { %140 = vmatpush.xpose.msk.msra.mxu0 %vm37_vm0, %v27_v5  ;;  %158 = vmatpush.xpose.msk.msra.mxu1 %vm37_vm0, %v27_v5 }
  0x1a   :  { %141 = vmatpush.xpose.msk.msra.mxu0 %vm37_vm0, %v26_v6  ;;  %159 = vmatpush.xpose.msk.msra.mxu1 %vm37_vm0, %v26_v6 }
  0x1e   :  { %142 = vmatpush.xpose.msk.msra.mxu0 %vm37_vm0, %v25_v7  ;;  %160 = vmatpush.xpose.msk.msra.mxu1 %vm37_vm0, %v25_v7 }
  0x22   :  { %143 = vmatpush.xpose.msk.msra.mxu0 %vm37_vm0, %v24_v8  ;;  %161 = vmatpush.xpose.msk.msra.mxu1 %vm37_vm0, %v24_v8 }
  0x26   :  { %144 = vmatpush.xpose.msk.msra.mxu0 %vm37_vm0, %v23_v9  ;;  %162 = vmatpush.xpose.msk.msra.mxu1 %vm37_vm0, %v23_v9 }
  0x2a   :  { %145 = vmatpush.xpose.msk.msra.mxu0 %vm37_vm0, %v22_v10  ;;  %163 = vmatpush.xpose.msk.msra.mxu1 %vm37_vm0, %v22_v10 }
  0x2e   :  { %146 = vmatpush.xpose.msk.msra.mxu0 %vm37_vm0, %v21_v11  ;;  %164 = vmatpush.xpose.msk.msra.mxu1 %vm37_vm0, %v21_v11 }
  0x32   :  { %147 = vmatpush.xpose.msk.msra.mxu0 %vm37_vm0, %v20_v12  ;;  %165 = vmatpush.xpose.msk.msra.mxu1 %vm37_vm0, %v20_v12 }
  0x36   :  { %148 = vmatpush.xpose.msk.msra.mxu0 %vm37_vm0, %v19_v13  ;;  %166 = vmatpush.xpose.msk.msra.mxu1 %vm37_vm0, %v19_v13 }
  0x3a   :  { %149 = vmatpush.xpose.msk.msra.mxu0 %vm37_vm0, %v18_v14  ;;  %167 = vmatpush.xpose.msk.msra.mxu1 %vm37_vm0, %v18_v14 }
  0x3e   :  { %150 = vmatpush.xpose.msk.msra.mxu0 %vm37_vm0, %v17_v15  ;;  %168 = vmatpush.xpose.msk.msra.mxu1 %vm37_vm0, %v17_v15 }
  0x41   :  { %151 = vmatmul.msk.f32.vlgmr.msra.gmra.mxu0 %vm37_vm0, %v15_v16  ;;  %152 = vmatmul.msk.f32.vlgmr.msra.gmra.mxu1 %vm37_vm0, %v16_v17 }
  0xbe   :  { %v109_v19 = vpop.f32.mrf.mxu0  ;;  %v112_v20 = vpop.f32.mrf.mxu1 }
  0xbf   :  { %v110_v21 = vadd.f32 %v172_v18, %v109_v19  ;;  %v113_v22 = vadd.f32 %v172_v18, %v112_v20 }
  0xc1   :  { %115 = vst [vmem:[#allocation2] sm:$0xff] %v110_v21 }
  0xc2   :  { %116 = vst [vmem:[#allocation2 + $0x8] sm:$0xff] %v113_v22 }
  0xc3   :  { %129 = dma.vmem_to_hbm [thread:$0]  %s122_s23, 256, %s124_s26, [#allocation3], %s200_s0, %s200_s0, %s201_s27  }
  0xc4   :  { %197 = dma.done.wait [#allocation3], 256  }
  0xc5   :  { %198 = vsyncadd [#allocation3], 4294967040 }
  0xc6   :  { %134 = vsyncpa [#allocation3], 1 }

</bundles_post_ra>
